<compile_context>
chip_gen: v7x
topology: tpu7x:2x2x1
jax: 0.10.0
libtpu: 0.0.40
codegen_flags: <defaults>
</compile_context>

<pallas_src>
import functools

import jax
import jax.numpy as jnp
from jax import lax
from jax.experimental import pallas as pl
from jax.experimental.pallas import tpu as pltpu


def _verification_kernel(pool_mode, tile_ls, lens, nblocks, fold, h, inv_total_l,
                         *refs):
    """refs = (*stream_refs, w_ref, b_ref, out_ref, acc_ref).

    stream_refs[s]: (TB, tile_ls[s], Hf) tile (native dtype)
    w_ref: (1, H) f32   b_ref: (1, 1) f32
    out_ref: (TB, 1) f32   acc_ref: (TB, Hf) f32 scratch
    Grid: (B tiles [parallel], sum(nblocks) reduction steps [arbitrary]).
    """
    n_streams = len(lens)
    stream_refs = refs[:n_streams]
    w_ref, b_ref, out_ref, acc_ref = refs[n_streams:]

    k = pl.program_id(1)

    @pl.when(k == 0)
    def _init():
        if pool_mode == "max":
            acc_ref[...] = jnp.full_like(acc_ref, -jnp.inf)
        else:
            acc_ref[...] = jnp.zeros_like(acc_ref)

    off = 0
    for s in range(n_streams):
        nb = nblocks[s]

        @pl.when((k >= off) & (k < off + nb))
        def _step(ref=stream_refs[s], tl=tile_ls[s], lp=lens[s], local_k=k - off):
            tile = ref[...]                                   # (TB, tl, Hf)
            if lp % tl != 0:
                # Ragged last tile: mask padded rows (-inf for max, 0 for sum).
                row = local_k * tl + lax.broadcasted_iota(jnp.int32, tile.shape, 1)
                valid = row < lp
                if pool_mode == "max":
                    tile = jnp.where(valid, tile, jnp.array(-jnp.inf, tile.dtype))
                else:
                    tile = jnp.where(valid, tile, jnp.array(0, tile.dtype))
            if pool_mode == "max":
                part = jnp.max(tile, axis=1).astype(jnp.float32)   # exact in bf16
                acc_ref[...] = jnp.maximum(acc_ref[...], part)
            else:
                part = jnp.sum(tile.astype(jnp.float32), axis=1)   # f32 accumulation
                acc_ref[...] = acc_ref[...] + part

        off += nb

    @pl.when(k == pl.num_programs(1) - 1)
    def _finish():
        acc = acc_ref[...]                                    # (TB, Hf) f32
        # Unfold lane packing: Hf = fold * h.
        pooled = acc[:, :h]
        for g in range(1, fold):
            piece = acc[:, g * h:(g + 1) * h]
            if pool_mode == "max":
                pooled = jnp.maximum(pooled, piece)
            else:
                pooled = pooled + piece
        if pool_mode == "avg":
            pooled = pooled * inv_total_l
        # H -> 1 linear as VPU multiply + lane reduce (avoids N=1 MXU matmul).
        score = jnp.sum(pooled * w_ref[...], axis=-1, keepdims=True) + b_ref[...]
        out_ref[...] = jnp.maximum(score, 0.0).astype(out_ref.dtype)


def _choose_tile(lp, tb, hf, itemsize, target_bytes):
    tl = int(target_bytes) // max(1, tb * hf * itemsize)
    tl = max(8, (tl // 8) * 8)
    return lp if tl >= lp else tl


def verification_module(D, Q, weight, bias, *, mode, pool_mode,
                        tile_target_bytes=2 * 1024 * 1024):
    """JAX/Pallas equivalent of VerificationModule.forward.

    D: (B, L_D, H)  Q: (B, L_Q, H) or None  weight: (1, H)  bias: (1,)
    Returns: (B, 1) float32.
    """
    if mode not in ("external", "internal"):
        raise ValueError("Choose a mode from - external / internal")
    if pool_mode not in ("max", "avg"):
        raise ValueError("Choose a mode from - max / avg")

    if mode == "external":
        if Q is None:
            raise ValueError("Q cannot be None when mode = external")
        streams = [D, Q]          # streamed separately: no HBM concat round trip
    else:
        streams = [D]

    B, _, H = D.shape
    total_l = sum(int(s.shape[1]) for s in streams)

    # Lane-densify: fold `g` consecutive seq rows into one 128-lane row when
    # H divides 128 and every stream length allows it (contiguous reshape: free).
    fold = 1
    if H < 128 and 128 % H == 0:
        g = 128 // H
        if all(int(s.shape[1]) % g == 0 for s in streams):
            fold = g
    hf = H * fold
    if fold > 1:
        streams = [s.reshape(B, s.shape[1] // fold, hf) for s in streams]

    # Batch tile -> parallel grid axis (shards across the 2 TCs on v7x).
    tb = 8 if (B > 8 and B % 8 == 0) else B

    itemsize = jnp.dtype(D.dtype).itemsize
    lens, tile_ls, nblocks = [], [], []
    for s in streams:
        lp = int(s.shape[1])
        tl = _choose_tile(lp, tb, hf, itemsize, tile_target_bytes)
        lens.append(lp)
        tile_ls.append(tl)
        nblocks.append(-(-lp // tl))

    def stream_spec(s_idx):
        off = sum(nblocks[:s_idx])
        nb = nblocks[s_idx]
        tl = tile_ls[s_idx]

        def index_map(i, k):
            # Clamp so the block index stays constant while other streams run
            # (the pipeline then skips redundant re-fetches).
            local = jnp.minimum(jnp.maximum(k - off, 0), nb - 1)
            return (i, local, 0)

        return pl.BlockSpec((tb, tl, hf), index_map)

    in_specs = [stream_spec(s) for s in range(len(streams))]
    in_specs += [pl.BlockSpec((1, H), lambda i, k: (0, 0)),   # weight, fetched once
                 pl.BlockSpec((1, 1), lambda i, k: (0, 0))]   # bias,   fetched once

    w = weight.reshape(1, H).astype(jnp.float32)
    b = bias.reshape(1, 1).astype(jnp.float32)

    kernel = functools.partial(
        _verification_kernel, pool_mode, tuple(tile_ls), tuple(lens),
        tuple(nblocks), fold, H, 1.0 / float(total_l))

    return pl.pallas_call(
        kernel,
        out_shape=jax.ShapeDtypeStruct((B, 1), jnp.float32),
        grid_spec=pltpu.PrefetchScalarGridSpec(
            num_scalar_prefetch=0,
            grid=(pl.cdiv(B, tb), sum(nblocks)),
            in_specs=in_specs,
            out_specs=pl.BlockSpec((tb, 1), lambda i, k: (i, 0)),
            scratch_shapes=[pltpu.VMEM((tb, hf), jnp.float32)],
        ),
        compiler_params=pltpu.CompilerParams(
            dimension_semantics=("parallel", "arbitrary")),
    )(*streams, w, b)


def _reference(D, Q, weight, bias, *, mode, pool_mode):
    DQ = jnp.concatenate((D, Q), axis=1) if mode == "external" else D
    pooled = jnp.max(DQ, axis=1) if pool_mode == "max" else jnp.mean(DQ, axis=1)
    return jnp.maximum(pooled @ weight.T + bias.reshape(1, 1), 0.0)


if __name__ == "__main__":
    key = jax.random.PRNGKey(0)
    k_d, k_q, k_w, k_b, k_d2, k_q2, k_d3, k_w3 = jax.random.split(key, 8)

    B, L_D, L_Q, H = 2, 8, 8, 32
    D = jax.random.normal(k_d, (B, L_D, H), dtype=jnp.float32)
    Q = jax.random.normal(k_q, (B, L_Q, H), dtype=jnp.float32)

    # Deterministic nn.Linear(H, 1)-style init: U(-1/sqrt(H), 1/sqrt(H)).
    bound = 1.0 / (H ** 0.5)
    weight = jax.random.uniform(k_w, (1, H), minval=-bound, maxval=bound,
                                dtype=jnp.float32)
    bias = jax.random.uniform(k_b, (1,), minval=-bound, maxval=bound,
                              dtype=jnp.float32)

    def check(out, ref):
        out = jax.block_until_ready(out)
        return (out.shape == ref.shape) and bool(
            jnp.allclose(out, ref, atol=1e-5, rtol=1e-5))

    ok = True

    # All mode / pool_mode combinations at the module's nominal small shapes.
    for mode in ("external", "internal"):
        for pool_mode in ("max", "avg"):
            q_arg = Q if mode == "external" else None
            out = verification_module(D, q_arg, weight, bias,
                                      mode=mode, pool_mode=pool_mode)
            ref = _reference(D, q_arg, weight, bias,
                             mode=mode, pool_mode=pool_mode)
            ok = ok and check(out, ref)

    # Exercise multi-tile streaming + ragged-tile masking (forced tiny tiles).
    D2 = jax.random.normal(k_d2, (B, 44, H), dtype=jnp.float32)
    Q2 = jax.random.normal(k_q2, (B, 20, H), dtype=jnp.float32)
    for pool_mode in ("max", "avg"):
        out = verification_module(D2, Q2, weight, bias, mode="external",
                                  pool_mode=pool_mode, tile_target_bytes=1024)
        ref = _reference(D2, Q2, weight, bias, mode="external",
                         pool_mode=pool_mode)
        ok = ok and check(out, ref)

    # Exercise the no-lane-fold path (H does not divide 128).
    H3 = 48
    D3 = jax.random.normal(k_d3, (B, 16, H3), dtype=jnp.float32)
    w3 = jax.random.uniform(k_w3, (1, H3), minval=-0.1, maxval=0.1,
                            dtype=jnp.float32)
    for pool_mode in ("max", "avg"):
        out = verification_module(D3, None, w3, bias, mode="internal",
                                  pool_mode=pool_mode)
        ref = _reference(D3, None, w3, bias, mode="internal",
                         pool_mode=pool_mode)
        ok = ok and check(out, ref)

    if ok:
        print("KERNEL_OK")
</pallas_src>

<mosaic_0001>
module attributes {stable_mosaic.version = 11 : i64} {
  func.func @_verification_kernel(%arg0: i32, %arg1: i32, %arg2: memref<2x2x128xf32, #tpu.memory_space<vmem>>, %arg3: memref<2x2x128xf32, #tpu.memory_space<vmem>>, %arg4: memref<1x32xf32, #tpu.memory_space<vmem>>, %arg5: memref<1x1xf32, #tpu.memory_space<vmem>>, %arg6: memref<2x1xf32, #tpu.memory_space<vmem>>, %arg7: memref<2x128xf32, #tpu.memory_space<vmem>>) attributes {dimension_semantics = [#tpu.dimension_semantics<parallel>, #tpu.dimension_semantics<arbitrary>], iteration_bounds = array<i64: 1, 2>, scalar_prefetch = 0 : i64, scratch_operands = 1 : i64, tpu.core_type = #tpu.core_type<tc>, window_params = [{transform_indices = @transform_0, window_bounds = array<i64: 2, 2, 128>}, {transform_indices = @transform_1, window_bounds = array<i64: 2, 2, 128>}, {pipeline_mode = #tpu.pipeline_mode<synchronous>, transform_indices = @transform_2, window_bounds = array<i64: 1, 32>}, {pipeline_mode = #tpu.pipeline_mode<synchronous>, transform_indices = @transform_3, window_bounds = array<i64: 1, 1>}, {transform_indices = @transform_4, window_bounds = array<i64: 2, 1>}]} {
    %c0_i32 = arith.constant 0 : i32
    %0 = arith.cmpi eq, %arg1, %c0_i32 : i32
    %1 = arith.extui %0 : i1 to i32
    %c0_i32_0 = arith.constant 0 : i32
    %2 = arith.cmpi ne, %1, %c0_i32_0 : i32
    scf.if %2 {
      %cst = arith.constant 0xFF800000 : f32
      %16 = vector.broadcast %cst : f32 to vector<2x128xf32>
      %c0 = arith.constant 0 : index
      %c0_7 = arith.constant 0 : index
      %17 = vector.load %arg7[%c0, %c0_7] : memref<2x128xf32, #tpu.memory_space<vmem>>, vector<2x128xf32>
      tpu.vector_store %arg7[%c0, %c0_7], %16 {strides = array<i32>} : memref<2x128xf32, #tpu.memory_space<vmem>>, vector<2x128xf32>,
    } else {
    }
    %c0_i32_1 = arith.constant 0 : i32
    %3 = arith.cmpi sge, %arg1, %c0_i32_1 : i32
    %c1_i32 = arith.constant 1 : i32
    %4 = arith.cmpi slt, %arg1, %c1_i32 : i32
    %5 = arith.andi %3, %4 : i1
    %6 = arith.extui %5 : i1 to i32
    %c0_i32_2 = arith.constant 0 : i32
    %7 = arith.cmpi ne, %6, %c0_i32_2 : i32
    scf.if %7 {
      %c0 = arith.constant 0 : index
      %c0_7 = arith.constant 0 : index
      %c0_8 = arith.constant 0 : index
      %16 = vector.load %arg2[%c0, %c0_7, %c0_8] : memref<2x2x128xf32, #tpu.memory_space<vmem>>, vector<2x2x128xf32>
      %cst = arith.constant dense<0xFF800000> : vector<2x128xf32>
      %17 = vector.multi_reduction <maximumf>, %16, %cst [1] : vector<2x2x128xf32> to vector<2x128xf32>
      %c0_9 = arith.constant 0 : index
      %c0_10 = arith.constant 0 : index
      %18 = vector.load %arg7[%c0_9, %c0_10] : memref<2x128xf32, #tpu.memory_space<vmem>>, vector<2x128xf32>
      %19 = arith.maximumf %18, %17 : vector<2x128xf32>
      %c0_11 = arith.constant 0 : index
      %c0_12 = arith.constant 0 : index
      %20 = vector.load %arg7[%c0_11, %c0_12] : memref<2x128xf32, #tpu.memory_space<vmem>>, vector<2x128xf32>
      tpu.vector_store %arg7[%c0_11, %c0_12], %19 {strides = array<i32>} : memref<2x128xf32, #tpu.memory_space<vmem>>, vector<2x128xf32>,
    } else {
    }
    %c1_i32_3 = arith.constant 1 : i32
    %8 = arith.cmpi sge, %arg1, %c1_i32_3 : i32
    %c2_i32 = arith.constant 2 : i32
    %9 = arith.cmpi slt, %arg1, %c2_i32 : i32
    %10 = arith.andi %8, %9 : i1
    %11 = arith.extui %10 : i1 to i32
    %c0_i32_4 = arith.constant 0 : i32
    %12 = arith.cmpi ne, %11, %c0_i32_4 : i32
    scf.if %12 {
      %c0 = arith.constant 0 : index
      %c0_7 = arith.constant 0 : index
      %c0_8 = arith.constant 0 : index
      %16 = vector.load %arg3[%c0, %c0_7, %c0_8] : memref<2x2x128xf32, #tpu.memory_space<vmem>>, vector<2x2x128xf32>
      %cst = arith.constant dense<0xFF800000> : vector<2x128xf32>
      %17 = vector.multi_reduction <maximumf>, %16, %cst [1] : vector<2x2x128xf32> to vector<2x128xf32>
      %c0_9 = arith.constant 0 : index
      %c0_10 = arith.constant 0 : index
      %18 = vector.load %arg7[%c0_9, %c0_10] : memref<2x128xf32, #tpu.memory_space<vmem>>, vector<2x128xf32>
      %19 = arith.maximumf %18, %17 : vector<2x128xf32>
      %c0_11 = arith.constant 0 : index
      %c0_12 = arith.constant 0 : index
      %20 = vector.load %arg7[%c0_11, %c0_12] : memref<2x128xf32, #tpu.memory_space<vmem>>, vector<2x128xf32>
      tpu.vector_store %arg7[%c0_11, %c0_12], %19 {strides = array<i32>} : memref<2x128xf32, #tpu.memory_space<vmem>>, vector<2x128xf32>,
    } else {
    }
    %c1_i32_5 = arith.constant 1 : i32
    %13 = arith.cmpi eq, %arg1, %c1_i32_5 : i32
    %14 = arith.extui %13 : i1 to i32
    %c0_i32_6 = arith.constant 0 : i32
    %15 = arith.cmpi ne, %14, %c0_i32_6 : i32
    scf.if %15 {
      %c0 = arith.constant 0 : index
      %c0_7 = arith.constant 0 : index
      %16 = vector.load %arg7[%c0, %c0_7] : memref<2x128xf32, #tpu.memory_space<vmem>>, vector<2x128xf32>
      %17 = vector.extract_strided_slice %16 {offsets = [0, 0], sizes = [2, 32], strides = [1, 1]} : vector<2x128xf32> to vector<2x32xf32>
      %18 = vector.extract_strided_slice %16 {offsets = [0, 32], sizes = [2, 32], strides = [1, 1]} : vector<2x128xf32> to vector<2x32xf32>
      %19 = arith.maximumf %17, %18 : vector<2x32xf32>
      %20 = vector.extract_strided_slice %16 {offsets = [0, 64], sizes = [2, 32], strides = [1, 1]} : vector<2x128xf32> to vector<2x32xf32>
      %21 = arith.maximumf %19, %20 : vector<2x32xf32>
      %22 = vector.extract_strided_slice %16 {offsets = [0, 96], sizes = [2, 32], strides = [1, 1]} : vector<2x128xf32> to vector<2x32xf32>
      %23 = arith.maximumf %21, %22 : vector<2x32xf32>
      %c0_8 = arith.constant 0 : index
      %c0_9 = arith.constant 0 : index
      %24 = vector.load %arg4[%c0_8, %c0_9] : memref<1x32xf32, #tpu.memory_space<vmem>>, vector<1x32xf32>
      %25 = vector.broadcast %24 : vector<1x32xf32> to vector<2x32xf32>
      %26 = arith.mulf %23, %25 : vector<2x32xf32>
      %cst = arith.constant dense<0.000000e+00> : vector<2xf32>
      %27 = vector.multi_reduction <add>, %26, %cst [1] : vector<2x32xf32> to vector<2xf32>
      %28 = vector.shape_cast %27 : vector<2xf32> to vector<2x1xf32>
      %c0_10 = arith.constant 0 : index
      %c0_11 = arith.constant 0 : index
      %29 = vector.load %arg5[%c0_10, %c0_11] : memref<1x1xf32, #tpu.memory_space<vmem>>, vector<1x1xf32>
      %30 = vector.broadcast %29 : vector<1x1xf32> to vector<2x1xf32>
      %31 = arith.addf %28, %30 : vector<2x1xf32>
      %cst_12 = arith.constant 0.000000e+00 : f32
      %32 = vector.broadcast %cst_12 : f32 to vector<2x1xf32>
      %33 = arith.maximumf %31, %32 : vector<2x1xf32>
      %c0_13 = arith.constant 0 : index
      %c0_14 = arith.constant 0 : index
      %34 = vector.load %arg6[%c0_13, %c0_14] : memref<2x1xf32, #tpu.memory_space<vmem>>, vector<2x1xf32>
      tpu.vector_store %arg6[%c0_13, %c0_14], %33 {strides = array<i32>} : memref<2x1xf32, #tpu.memory_space<vmem>>, vector<2x1xf32>,
    } else {
    }
    return
  }
  func.func @transform_0(%arg0: i32, %arg1: i32) -> (i32, i32, i32) {
    %c0_i32 = arith.constant 0 : i32
    %0 = arith.subi %arg1, %c0_i32 : i32
    %c0_i32_0 = arith.constant 0 : i32
    %1 = arith.maxsi %0, %c0_i32_0 : i32
    %c0_i32_1 = arith.constant 0 : i32
    %2 = arith.minsi %1, %c0_i32_1 : i32
    %c0_i32_2 = arith.constant 0 : i32
    %c0_i32_3 = arith.constant 0 : i32
    return %arg0, %2, %c0_i32_2 : i32, i32, i32
  }
  func.func @transform_1(%arg0: i32, %arg1: i32) -> (i32, i32, i32) {
    %c1_i32 = arith.constant 1 : i32
    %0 = arith.subi %arg1, %c1_i32 : i32
    %c0_i32 = arith.constant 0 : i32
    %1 = arith.maxsi %0, %c0_i32 : i32
    %c0_i32_0 = arith.constant 0 : i32
    %2 = arith.minsi %1, %c0_i32_0 : i32
    %c0_i32_1 = arith.constant 0 : i32
    %c0_i32_2 = arith.constant 0 : i32
    return %arg0, %2, %c0_i32_1 : i32, i32, i32
  }
  func.func @transform_2(%arg0: i32, %arg1: i32) -> (i32, i32) {
    %c0_i32 = arith.constant 0 : i32
    %c0_i32_0 = arith.constant 0 : i32
    %c0_i32_1 = arith.constant 0 : i32
    return %c0_i32, %c0_i32_0 : i32, i32
  }
  func.func @transform_3(%arg0: i32, %arg1: i32) -> (i32, i32) {
    %c0_i32 = arith.constant 0 : i32
    %c0_i32_0 = arith.constant 0 : i32
    %c0_i32_1 = arith.constant 0 : i32
    return %c0_i32, %c0_i32_0 : i32, i32
  }
  func.func @transform_4(%arg0: i32, %arg1: i32) -> (i32, i32) {
    %c0_i32 = arith.constant 0 : i32
    %c0_i32_0 = arith.constant 0 : i32
    return %arg0, %c0_i32 : i32, i32
  }
}

</mosaic_0001>

<bundles_post_ra>
// kernel: tpu_custom_call.1
= control target key start
LH: loop header
LB: loop body
LE: loop exit
PB: predicated region body
PF: predicated region fallthrough
CT: control target
= control target key end

     0   :  { %s772_s0 = inlined_call_operand.hbm [shape: f32[2,2,128], index: 0, kind: input, shape index: {}]   ;;  %s773_s1 = inlined_call_operand.vmem [shape: f32[2,2,128], index: 1, kind: input, shape index: {}]   ;;  %s774_s2 = inlined_call_operand.vmem [shape: f32[1,32], index: 2, kind: input, shape index: {}]   ;;  %s775_s3 = inlined_call_operand.<no memory space> [shape: f32[1,1], index: 3, kind: input, shape index: {}]   ;;  %s776_s4 = inlined_call_operand.vmem [shape: f32[2,1], index: 4, kind: output, shape index: {}]  }
   0x1   :  { %v9_v0 = vstv %s775_s3 }
   0x2   :  { %10 = vst [vmem:[#allocation3] sm:$0x1] %v9_v0 }
   0x3   :  { %11 = vsyncpa [#allocation5], 0 }
   0x4   :  { %13 = vsyncpa [#allocation5 + $0x1], 0  ;;  %s690_s17 = smov 0   ;;  %s692_s18 = smov 0  }
   0x5   :  { %s694_s19 = smov 0  }
   0x6 LB: > { %s513_s3 = sadd.s32 4294967295, %s653_s19   ;;  %s28_s20 = sadd.s32 1, %s649_s18  ;;  %s653_s19 = sphi %s694_s19, %s19_s19   ;;  %s649_s18 = sphi %s692_s18, %s784_s18   ;;  %s645_s17 = sphi %s690_s17, %s783_s17  }
   0x7   : > { %p29_p0 = scmp.ge.s32.totalorder %s28_s20, 2  ;;  %p56_p1 = scmp.eq.s32.totalorder %s653_s19, 0 }
   0x8   : > { %p708_p2 = scmp.eq.s32.totalorder %s513_s3, 0  ;;  %p567_p3 = scmp.lt.s32.totalorder %s653_s19, 2 }
   0x9   : > { %s786_s20 = smov (%p29_p0, %s28_s20), 0  ;;  %s655_s22 = smov [#allocation4]  }
   0xa   : > { %s778_s21 = scalar_select %p708_p2, 1, 0 }
   0xb   : > { %s213_s23 = sshll.u32 %s655_s22, 4  ;;  %p715_p4 = pnand %p567_p3, %p56_p1  ;;  %s214_s23 = int_to_ptr.vmem [resolvable:$true] %s213_s23 }
   0xc   : > { %s599_s27 = scalar_lea.hbm %s772_s0, 64 }
   0xd   : > { %p600_p7 = scmp.ne.s32.totalorder %s772_s0, %s599_s27  ;;  %p601_p8 = pneg %p715_p4 }
   0xe   : > { %p606_p11 = scmp.lt.u32.totalorder %s599_s27, %s772_s0 }
   0xf   : > { %p602_p9 = pnand %p601_p8, %p600_p7 }
  0x11   : > { %p603_p10 = pneg %p602_p9 }
  0x13   : > { %p608_p12 = pnand %p606_p11, %p603_p10 }
  0x15   : > { %611 = shalt.err (!%p608_p12)
}
  0x16   : > { %s612_s6 = scalar_lea.vmem %s214_s23, 64  ;;  %s619_s7 = scalar_lea.vmem %s214_s23, 128 }
  0x17   : > { %p613_p13 = scmp.ne.s32.totalorder %s214_s23, %s612_s6  ;;  %p620_p3 = scmp.lt.s32.totalorder %s214_s23, %s214_s23 }
  0x18   : > { %p621_p5 = scmp.lt.s32.totalorder %s619_s7, %s612_s6 }
  0x19   : > { %p615_p0 = pnand %p613_p13, %p601_p8 }
  0x1a   : > { %p622_p6 = por %p621_p5, %p620_p3 }
  0x1b   : > { %p616_p1 = pneg %p615_p0 }
  0x1d   : > { %p623_p2 = pnand %p622_p6, %p616_p1 }
  0x1f   : > { %626 = shalt.err (!%p623_p2)
}
  0x20   : > { %s656_s8 = smov 32   ;;  %s657_s9 = smov 2  }
  0x21   : > { %566 = dma.hbm_to_vmem [thread:$0]  (!%p715_p4), %s772_s0, 64, %s214_s23, [#allocation5], %s656_s8, %s656_s8, %s657_s9  }
  0x22   : > { %p780_p7 = scmp.lt.s32.totalorder %s653_s19, 3  ;;  %p781_p9 = scmp.ge.s32.totalorder %s653_s19, 1 }
  0x24   : > { %p244_p8 = pnand %p781_p9, %p780_p7 }
  0x25   : > { %p782_p10 = scmp.ne.s32.totalorder (!%p244_p8), %s778_s21, 0 }
  0x26   : > { %247 = sbr.rel (%p244_p8) target bundleno = 377 (0x179), region = 36 }
  0x2d   : > { %640 = dma.done.wait (%p782_p10), [#allocation5], 64  }
  0x2e   : > { %642 = vsyncadd (%p782_p10), [#allocation5], 4294967232  ;;  %p554_p2 = scmp.ne.s32.totalorder %s645_s17, 0 }
  0x2f   : > { %v658_v1 = vmov (!%p554_p2), -inf  }
  0x30   : > { %321 = sbr.rel (%p554_p2) target bundleno = 55 (0x37), region = 44  ;;  %322 = vst [vmem:[#allocation2] sm:$0x3] (!%p554_p2), %v658_v1 }
  0x37 PF: > { %p323_p5 = scmp.ge.s32.totalorder %s645_s17, 0  ;;  %p324_p4 = scmp.lt.s32.totalorder %s645_s17, 1 }
  0x39   : > { %p325_p6 = pnand %p324_p4, %p323_p5 }
  0x3a   : > { %v329_v2 = vld [vmem:[#allocation4] sm:$0x3] (!%p325_p6)  ;;  %v330_v3 = vld [vmem:[#allocation4 + $0x2] sm:$0x3] (!%p325_p6)  ;;  %vm331_vm0 = vcmask (!%p325_p6), 1041408   ;;  %vm349_vm1 = vcmask (!%p325_p6), 1041409  }
  0x3b   : > { %328 = sbr.rel (%p325_p6) target bundleno = 76 (0x4c), region = 48  ;;  %v332_v4 = vsel (!%p325_p6), %vm331_vm0, %v329_v2, -inf  ;;  %v339_v5 = vsel (!%p325_p6), %vm331_vm0, %v330_v3, -inf  ;;  %v346_v18 = vld [vmem:[#allocation2] sm:$0x3] (!%p325_p6) }
  0x3c   : > { %v333_v6 = vrot.slane (!%p325_p6), %v332_v4, 4  ;;  %v340_v7 = vrot.slane (!%p325_p6), %v339_v5, 4 }
  0x3e   : > { %v334_v8 = vmax.f32 (!%p325_p6), %v332_v4, %v333_v6  ;;  %v341_v9 = vmax.f32 (!%p325_p6), %v339_v5, %v340_v7 }
  0x40   : > { %v335_v10 = vrot.slane (!%p325_p6), %v334_v8, 2  ;;  %v342_v11 = vrot.slane (!%p325_p6), %v341_v9, 2 }
  0x42   : > { %v336_v12 = vmax.f32 %v334_v8, %v335_v10  ;;  %v343_v13 = vmax.f32 %v341_v9, %v342_v11 }
  0x44   : > { %v337_v14 = vrot.slane %v336_v12, 1  ;;  %v344_v15 = vrot.slane %v343_v13, 1 }
  0x46   : > { %v338_v16 = vmax.f32 %v336_v12, %v337_v14  ;;  %v345_v17 = vmax.f32 %v343_v13, %v344_v15 }
  0x48   : > { %v350_v19 = vsel %vm349_vm1, %v345_v17, %v338_v16 }
  0x49   : > { %v352_v20 = vmax.f32 %v346_v18, %v350_v19 }
  0x4b   : > { %353 = vst [vmem:[#allocation2] sm:$0x3] %v352_v20 }
  0x4c PF: > { %p354_p11 = scmp.ge.s32.totalorder %s645_s17, 1  ;;  %p355_p12 = scmp.lt.s32.totalorder %s645_s17, 2 }
  0x4e   : > { %p356_p13 = pnand %p355_p12, %p354_p11 }
  0x4f   : > { %v360_v21 = vld [vmem:[%s773_s1] sm:$0x3] (!%p356_p13)  ;;  %v361_v22 = vld [vmem:[%s773_s1 + $0x2] sm:$0x3] (!%p356_p13)  ;;  %vm362_vm2 = vcmask (!%p356_p13), 1041408   ;;  %vm380_vm3 = vcmask (!%p356_p13), 1041409  }
  0x50   : > { %359 = sbr.rel (%p356_p13) target bundleno = 97 (0x61), region = 52  ;;  %v363_v23 = vsel (!%p356_p13), %vm362_vm2, %v360_v21, -inf  ;;  %v370_v24 = vsel (!%p356_p13), %vm362_vm2, %v361_v22, -inf }
  0x51   : > { %v364_v25 = vrot.slane (!%p356_p13), %v363_v23, 4  ;;  %v371_v26 = vrot.slane (!%p356_p13), %v370_v24, 4 }
  0x52   : > { %v377_v37 = vld [vmem:[#allocation2] sm:$0x3] (!%p356_p13) }
  0x53   : > { %v365_v27 = vmax.f32 (!%p356_p13), %v363_v23, %v364_v25  ;;  %v372_v28 = vmax.f32 (!%p356_p13), %v370_v24, %v371_v26 }
  0x55   : > { %v366_v29 = vrot.slane (!%p356_p13), %v365_v27, 2  ;;  %v373_v30 = vrot.slane (!%p356_p13), %v372_v28, 2 }
  0x57   : > { %v367_v31 = vmax.f32 %v365_v27, %v366_v29  ;;  %v374_v32 = vmax.f32 %v372_v28, %v373_v30 }
  0x59   : > { %v368_v33 = vrot.slane %v367_v31, 1  ;;  %v375_v34 = vrot.slane %v374_v32, 1 }
  0x5b   : > { %v369_v35 = vmax.f32 %v367_v31, %v368_v33  ;;  %v376_v36 = vmax.f32 %v374_v32, %v375_v34 }
  0x5d   : > { %v381_v38 = vsel %vm380_vm3, %v376_v36, %v369_v35 }
  0x5e   : > { %v383_v39 = vmax.f32 %v377_v37, %v381_v38 }
  0x60   : > { %384 = vst [vmem:[#allocation2] sm:$0x3] %v383_v39 }
  0x61 PF: > { %p555_p0 = scmp.ne.s32.totalorder %s645_s17, 1 }
  0x62   : > { %s659_s16 = smov (!%p555_p0), 96   ;;  %s660_s3 = smov (!%p555_p0), 32   ;;  %v556_v46 = vld [vmem:[%s774_s2] ss:$0 sm:$0xff] (!%p555_p0)  ;;  %vm411_vm4 = vcmask (!%p555_p0), 254976   ;;  %vm424_vm5 = vcmask (!%p555_p0), 1024  }
  0x63   : > { %388 = sbr.rel (%p555_p0) target bundleno = 377 (0x179), region = 56  ;;  %s661_s21 = smov (!%p555_p0), 64   ;;  %v557_v50 = vld [vmem:[#allocation3] ss:$0 sm:$0xff] (!%p555_p0) }
  0x67   : > { %v389_v40 = vld [vmem:[#allocation2] sm:$0x3] (!%p555_p0) }
  0x68   : > { %391 = vrot.lane.b32.xlu0 (!%p555_p0), %v389_v40, %s659_s16  ;;  %399 = vrot.lane.b32.xlu1 (!%p555_p0), %v389_v40, %s660_s3 }
  0x6c   : > { %395 = vrot.lane.b32.xlu0 %v389_v40, %s661_s21 }
  0xda   : > { %v392_v41 = vpop.permute.xlu0 %391  ;;  %v400_v44 = vpop.permute.xlu1 %399 }
  0xdb   : > { %v394_v42 = vmax.f32 %v389_v40, %v392_v41 }
  0xde   : > { %v396_v43 = vpop.permute.xlu0 %395 }
  0xdf   : > { %v398_v45 = vmax.f32 %v394_v42, %v396_v43 }
  0xe1   : > { %v402_v47 = vmax.f32 %v398_v45, %v400_v44 }
  0xe3   : > { %v410_v48 = vmul.f32 %v556_v46, %v402_v47 }
  0xe5   : > { %v412_v49 = vsel %vm411_vm4, %v410_v48, 0.0 }
  0xe6   : > { %413 = vadd.xlane.f32.xlu1 %v412_v49 }
 0x173   : > { %v414_v51 = vpop.xlane.xlu1 %413 }
 0x174   : > { %v422_v52 = vadd.f32 %v557_v50, %v414_v51 }
 0x176   : > { %v423_v53 = vmax.f32 %v422_v52, 0.0 }
 0x178   : > { %425 = vst.msk [vmem:[%s776_s4] sm:$0x3] %vm424_vm5, %v423_v53 }
 0x179 PF: > { %s19_s19 = sadd.s32 1, %s653_s19   ;;  %s783_s17 = smov %s649_s18 }
 0x17a   : > { %p16_p1 = scmp.ge.s32.totalorder %s19_s19, 4   ;;  %s784_s18 = smov %s786_s20 }
 0x17c   :  { %18 = sbr.rel (!%p16_p1) target bundleno = 6 (0x6), region = 95 }
 0x183   :  { %445 = vsyncpa [#allocation5], 1 }
 0x184   :  { %447 = vsyncpa [#allocation5 + $0x1], 1 }

</bundles_post_ra>
